<compile_context>
chip_gen: v6e
topology: v6e:2x2x1
jax: 0.10.0
libtpu: 0.0.40
codegen_flags: <defaults>
</compile_context>

<pallas_src>
import functools

import jax
import jax.numpy as jnp
from jax.experimental import pallas as pl
from jax.experimental.pallas import tpu as pltpu

_BATCH_TILE = 1024   # default batch tile for the pipelined path (multiple of 8)
_MIN_SPLIT = 256     # at or below this batch, a single gridless block is fastest


def _round_up(n, m):
    return ((n + m - 1) // m) * m


def _mlp_kernel(x_ref, w1_ref, b1_ref, w2_ref, b2_ref, o_ref):
    # NOTE: on the last (partial) batch tile, rows past B hold out-of-range
    # data; that is only safe because every row is independent (no batch
    # reductions inside this kernel).
    h = jnp.dot(x_ref[...], w1_ref[...],
                preferred_element_type=jnp.float32,
                precision=jax.lax.Precision.HIGHEST)
    h = jnp.maximum(h + b1_ref[...], 0.0)            # [1, H] bias row broadcasts
    y = jnp.dot(h, w2_ref[...],
                preferred_element_type=jnp.float32,
                precision=jax.lax.Precision.HIGHEST)
    o_ref[...] = (y + b2_ref[...]).astype(o_ref.dtype)


def prepare_params(w1, b1, w2, b2):
    """One-time layout prep (per parameter set, not per forward):
    transpose PyTorch-layout weights into MXU-native [K, N] orientation and
    reshape biases to broadcastable rows. No output padding: the kernel
    writes (B, d_out) directly."""
    w1t = jnp.asarray(w1).T                # [d_in, hidden]
    w2t = jnp.asarray(w2).T                # [hidden, d_out]
    b1r = jnp.asarray(b1).reshape(1, -1)   # [1, hidden]
    b2r = jnp.asarray(b2).reshape(1, -1)   # [1, d_out]
    return (w1t, b1r, w2t, b2r)


@functools.partial(jax.jit, static_argnames=("batch_tile",))
def centralized_network_forward(x, params, *, batch_tile=_BATCH_TILE):
    """x: [B, input_size]; params from prepare_params(). Returns [B, d_out]."""
    w1t, b1r, w2t, b2r = params
    B, d_in = x.shape
    hidden = w1t.shape[1]
    d_out = w2t.shape[1]

    if B <= _MIN_SPLIT:
        # Small batch: single gridless invocation, everything in one VMEM block.
        return pl.pallas_call(
            _mlp_kernel,
            out_shape=jax.ShapeDtypeStruct((B, d_out), x.dtype),
        )(x, w1t, b1r, w2t, b2r)

    # Large batch: tile over batch only; weights/biases stay VMEM-resident
    # across grid steps (constant index_map). Clamp the tile so the grid has
    # >= 2 steps (feeds both TensorCores on v7x) but never below the point
    # where per-grid-step overhead dominates (cap = batch_tile).
    tile = min(batch_tile, _round_up(pl.cdiv(B, 2), 8))
    grid = (pl.cdiv(B, tile),)
    return pl.pallas_call(
        _mlp_kernel,
        out_shape=jax.ShapeDtypeStruct((B, d_out), x.dtype),
        grid_spec=pltpu.PrefetchScalarGridSpec(
            num_scalar_prefetch=0,
            grid=grid,
            in_specs=[
                pl.BlockSpec((tile, d_in), lambda i: (i, 0)),
                pl.BlockSpec((d_in, hidden), lambda i: (0, 0)),
                pl.BlockSpec((1, hidden), lambda i: (0, 0)),
                pl.BlockSpec((hidden, d_out), lambda i: (0, 0)),
                pl.BlockSpec((1, d_out), lambda i: (0, 0)),
            ],
            out_specs=pl.BlockSpec((tile, d_out), lambda i: (i, 0)),
        ),
        compiler_params=pltpu.CompilerParams(
            dimension_semantics=("parallel",)),
    )(x, w1t, b1r, w2t, b2r)


def init_params(key, input_size, output_size, hidden):
    """Deterministic init mimicking PyTorch nn.Linear default
    (uniform(-1/sqrt(fan_in), 1/sqrt(fan_in)))."""
    k1, k2, k3, k4 = jax.random.split(key, 4)
    bound1 = 1.0 / jnp.sqrt(input_size)
    bound2 = 1.0 / jnp.sqrt(hidden)
    w1 = jax.random.uniform(k1, (hidden, input_size), jnp.float32, -bound1, bound1)
    b1 = jax.random.uniform(k2, (hidden,), jnp.float32, -bound1, bound1)
    w2 = jax.random.uniform(k3, (output_size, hidden), jnp.float32, -bound2, bound2)
    b2 = jax.random.uniform(k4, (output_size,), jnp.float32, -bound2, bound2)
    return w1, b1, w2, b2


if __name__ == "__main__":
    # CentralizedNetwork(input_size=32, output_size=8, model_layer_size=64)
    input_size, hidden, output_size = 32, 64, 8

    key = jax.random.PRNGKey(0)
    kx1, kx2, kp = jax.random.split(key, 3)
    w1, b1, w2, b2 = init_params(kp, input_size, output_size, hidden)
    params = prepare_params(w1, b1, w2, b2)

    def ref_forward(x):
        return jnp.maximum(x @ w1.T + b1, 0.0) @ w2.T + b2

    # 1) Tiny batch -> gridless single-block path.
    x_small = jax.random.normal(kx1, (2, input_size), jnp.float32)
    out_small = jax.block_until_ready(
        centralized_network_forward(x_small, params))
    assert out_small.shape == (2, output_size)
    assert jnp.allclose(out_small, ref_forward(x_small), atol=1e-5, rtol=1e-5)

    # 2) Larger batch -> batch-tiled path with >= 2 grid steps (v7x megacore),
    #    weights resident in VMEM, unpadded (B, 8) output stores.
    x_big = jax.random.normal(kx2, (512, input_size), jnp.float32)
    out_big = jax.block_until_ready(
        centralized_network_forward(x_big, params))
    assert out_big.shape == (512, output_size)
    assert jnp.allclose(out_big, ref_forward(x_big), atol=1e-5, rtol=1e-5)

    print("KERNEL_OK")
</pallas_src>

<mosaic_0001>
module attributes {stable_mosaic.version = 11 : i64} {
  func.func @_mlp_kernel(%arg0: memref<2x32xf32, #tpu.memory_space<vmem>>, %arg1: memref<32x64xf32, #tpu.memory_space<vmem>>, %arg2: memref<1x64xf32, #tpu.memory_space<vmem>>, %arg3: memref<64x8xf32, #tpu.memory_space<vmem>>, %arg4: memref<1x8xf32, #tpu.memory_space<vmem>>, %arg5: memref<2x8xf32, #tpu.memory_space<vmem>>) attributes {dimension_semantics = [], scalar_prefetch = 0 : i64, scratch_operands = 0 : i64, tpu.core_type = #tpu.core_type<tc>} {
    %c0 = arith.constant 0 : index
    %c0_0 = arith.constant 0 : index
    %0 = vector.load %arg0[%c0, %c0_0] : memref<2x32xf32, #tpu.memory_space<vmem>>, vector<2x32xf32>
    %c0_1 = arith.constant 0 : index
    %c0_2 = arith.constant 0 : index
    %1 = vector.load %arg1[%c0_1, %c0_2] : memref<32x64xf32, #tpu.memory_space<vmem>>, vector<32x64xf32>
    %cst = arith.constant dense<0.000000e+00> : vector<2x64xf32>
    %2 = tpu.matmul %0, %1, %cst {dimension_numbers = #tpu.dot_dimension_numbers<[1], [0], [0], [1], [0, 0, 1, 1], [], []>, precision = #tpu.contract_precision<fp32>} : vector<2x32xf32>, vector<32x64xf32>, vector<2x64xf32> -> vector<2x64xf32>
    %c0_3 = arith.constant 0 : index
    %c0_4 = arith.constant 0 : index
    %3 = vector.load %arg2[%c0_3, %c0_4] : memref<1x64xf32, #tpu.memory_space<vmem>>, vector<1x64xf32>
    %4 = vector.broadcast %3 : vector<1x64xf32> to vector<2x64xf32>
    %5 = arith.addf %2, %4 : vector<2x64xf32>
    %cst_5 = arith.constant 0.000000e+00 : f32
    %6 = vector.broadcast %cst_5 : f32 to vector<2x64xf32>
    %7 = arith.maximumf %5, %6 : vector<2x64xf32>
    %c0_6 = arith.constant 0 : index
    %c0_7 = arith.constant 0 : index
    %8 = vector.load %arg3[%c0_6, %c0_7] : memref<64x8xf32, #tpu.memory_space<vmem>>, vector<64x8xf32>
    %cst_8 = arith.constant dense<0.000000e+00> : vector<2x8xf32>
    %9 = tpu.matmul %7, %8, %cst_8 {dimension_numbers = #tpu.dot_dimension_numbers<[1], [0], [0], [1], [0, 0, 1, 1], [], []>, precision = #tpu.contract_precision<fp32>} : vector<2x64xf32>, vector<64x8xf32>, vector<2x8xf32> -> vector<2x8xf32>
    %c0_9 = arith.constant 0 : index
    %c0_10 = arith.constant 0 : index
    %10 = vector.load %arg4[%c0_9, %c0_10] : memref<1x8xf32, #tpu.memory_space<vmem>>, vector<1x8xf32>
    %11 = vector.broadcast %10 : vector<1x8xf32> to vector<2x8xf32>
    %12 = arith.addf %9, %11 : vector<2x8xf32>
    %c0_11 = arith.constant 0 : index
    %c0_12 = arith.constant 0 : index
    %13 = vector.load %arg5[%c0_11, %c0_12] : memref<2x8xf32, #tpu.memory_space<vmem>>, vector<2x8xf32>
    tpu.vector_store %arg5[%c0_11, %c0_12], %12 {strides = array<i32>} : memref<2x8xf32, #tpu.memory_space<vmem>>, vector<2x8xf32>,
    return
  }
}

</mosaic_0001>

<bundles_post_ra>
// kernel: centralized_network_forward.1
= control target key start
LH: loop header
LB: loop body
LE: loop exit
PB: predicated region body
PF: predicated region fallthrough
CT: control target
= control target key end

     0   :  { %vm33_vm0 = vcmask 261120   ;;  %v1386_v3 = vmov 0.0   ;;  %vm1387_vm1 = vmmov 0   ;;  %s1719_s0 = inlined_call_operand.vmem [shape: f32[2,32], index: 0, kind: input, shape index: {}]   ;;  %s1720_s1 = inlined_call_operand.vmem [shape: f32[32,64], index: 1, kind: input, shape index: {}]   ;;  %s1721_s2 = inlined_call_operand.vmem [shape: f32[1,64], index: 2, kind: input, shape index: {}]   ;;  %s1722_s3 = inlined_call_operand.vmem [shape: f32[64,8], index: 3, kind: input, shape index: {}]   ;;  %s1723_s4 = inlined_call_operand.vmem [shape: f32[1,8], index: 4, kind: input, shape index: {}]   ;;  %s1724_s5 = inlined_call_operand.hbm [shape: f32[2,8], index: 5, kind: output, shape index: {}]  }
   0x1   :  { %v25_v0 = vld [vmem:[%s1720_s1 + $0x18] sm:$0xff]  ;;  %v24_v1 = vld [vmem:[%s1720_s1 + $0x10] sm:$0xff]  ;;  %v23_v2 = vld [vmem:[%s1720_s1 + $0x8] sm:$0xff]  ;;  %1181 = vmatprep.subr.mxu0 %v1386_v3  ;;  %1192 = vmatprep.subr.mxu1 %v1386_v3 }
   0x2   :  { %v1429_v4 = vand.u32 4294901760, %v25_v0  ;;  %v1431_v5 = vand.u32 4294901760, %v24_v1  ;;  %v1433_v6 = vand.u32 4294901760, %v23_v2  ;;  %v22_v7 = vld [vmem:[%s1720_s1] sm:$0xff]  ;;  %1189 = vmatprep.mubr.msk.f32.mxu0 %vm1387_vm1, %v1386_v3  ;;  %1200 = vmatprep.mubr.msk.f32.mxu1 %vm1387_vm1, %v1386_v3 }
   0x3   :  { %v21_v8 = vld [vmem:[%s1719_s0] sm:$0x3]  ;;  %v1442_v9 = vand.u32 4294901760, %v22_v7 }
   0x4   :  { %v35_v10 = vsel %vm33_vm0, %v21_v8, 0 }
   0x5   :  { %10 = vsyncpa [#allocation3], 0  ;;  %1182 = vmatpush3.msra.mxu0 %v1429_v4  ;;  %v142_v11 = vsub.f32 %v25_v0, %v1429_v4  ;;  %v1450_v12 = vand.u32 4294901760, %v35_v10  ;;  %v149_v13 = vsub.f32 %v24_v1, %v1431_v5  ;;  %v156_v14 = vsub.f32 %v23_v2, %v1433_v6  ;;  %v530_v32 = vld [vmem:[%s1722_s3 + $0x38] sm:$0xff]  ;;  %v529_v34 = vld [vmem:[%s1722_s3 + $0x30] sm:$0xff]  ;;  %s1388_s19 = smov [#allocation2]  }
   0x6   :  { %1183 = vmatprep.subr.mxu0 %v1386_v3  ;;  %v163_v15 = vsub.f32 %v22_v7, %v1442_v9  ;;  %v1509_v33 = vand.u32 4294901760, %v530_v32  ;;  %v1517_v36 = vand.u32 4294901760, %v529_v34  ;;  %v528_v37 = vld [vmem:[%s1722_s3 + $0x28] sm:$0xff]  ;;  %v527_v41 = vld [vmem:[%s1722_s3 + $0x20] sm:$0xff]  ;;  %v526_v46 = vld [vmem:[%s1722_s3 + $0x18] sm:$0xff]  ;;  %vm538_vm2 = vcmask 523264  }
   0x7   :  { %1184 = vmatpush3.msra.mxu0 %v1431_v5  ;;  %v143_v16 = vand.u32 4294901760, %v142_v11  ;;  %v107_v17 = vsub.f32 %v35_v10, %v1450_v12  ;;  %v150_v18 = vand.u32 4294901760, %v149_v13  ;;  %v157_v19 = vand.u32 4294901760, %v156_v14  ;;  %v525_v52 = vld [vmem:[%s1722_s3 + $0x10] sm:$0xff]  ;;  %v524_v58 = vld [vmem:[%s1722_s3 + $0x8] sm:$0xff]  ;;  %v523_v0 = vld [vmem:[%s1722_s3] sm:$0xff] }
   0x8   :  { %1185 = vmatprep.subr.mxu0 %v1386_v3  ;;  %v164_v20 = vand.u32 4294901760, %v163_v15  ;;  %v1515_v35 = vsub.f32 %v530_v32, %v1509_v33  ;;  %v1526_v39 = vsub.f32 %v529_v34, %v1517_v36  ;;  %v1528_v40 = vand.u32 4294901760, %v528_v37  ;;  %s1087_s20 = sshll.u32 %s1388_s19, 4  ;;  %s1088_s20 = int_to_ptr.vmem [resolvable:$true] %s1087_s20 }
   0x9   :  { %1186 = vmatpush3.msra.mxu0 %v1433_v6  ;;  %v144_v21 = vsub.f32 %v142_v11, %v143_v16  ;;  %v108_v22 = vand.u32 4294901760, %v107_v17  ;;  %v151_v23 = vsub.f32 %v149_v13, %v150_v18  ;;  %v158_v24 = vsub.f32 %v156_v14, %v157_v19  ;;  %s1364_s21 = scalar_lea.vmem %s1088_s20, 32  ;;  %p1369_p1 = scmp.lt.s32.totalorder %s1088_s20, %s1088_s20 }
   0xa   :  { %1187 = vmatprep.subr.mxu0 %v1386_v3  ;;  %v165_v28 = vsub.f32 %v163_v15, %v164_v20  ;;  %v644_v38 = vand.u32 4294901760, %v1515_v35  ;;  %v651_v43 = vand.u32 4294901760, %v1526_v39  ;;  %v1540_v44 = vsub.f32 %v528_v37, %v1528_v40  ;;  %p1365_p0 = scmp.ne.s32.totalorder %s1088_s20, %s1364_s21  ;;  %p1370_p2 = scmp.lt.s32.totalorder %s1364_s21, %s1364_s21 }
   0xb   :  { %1188 = vmatpush3.msra.mxu0 %v1442_v9  ;;  %v145_v25 = vand.u32 4294901760, %v144_v21  ;;  %v109_v26 = vsub.f32 %v107_v17, %v108_v22  ;;  %v152_v27 = vand.u32 4294901760, %v151_v23  ;;  %v159_v30 = vand.u32 4294901760, %v158_v24 }
   0xc   :  { %1203 = vmatprep.subr.mxu0 %v1386_v3  ;;  %v166_v31 = vand.u32 4294901760, %v165_v28  ;;  %v645_v42 = vsub.f32 %v1515_v35, %v644_v38  ;;  %v1542_v45 = vand.u32 4294901760, %v527_v41  ;;  %v652_v48 = vsub.f32 %v1526_v39, %v651_v43  ;;  %p1371_p3 = por %p1370_p2, %p1369_p1 }
   0xd   :  { %1193 = vmatpush3.msra.mxu1 %v145_v25  ;;  %v110_v29 = vand.u32 4294901760, %v109_v26  ;;  %v658_v49 = vand.u32 4294901760, %v1540_v44  ;;  %v1557_v51 = vand.u32 4294901760, %v526_v46  ;;  %v1567_v56 = vand.u32 4294901760, %v525_v52 }
   0xe   :  { %1194 = vmatprep.subr.mxu1 %v1386_v3  ;;  %v646_v47 = vand.u32 4294901760, %v645_v42  ;;  %v1554_v50 = vsub.f32 %v527_v41, %v1542_v45  ;;  %v653_v53 = vand.u32 4294901760, %v652_v48  ;;  %v1583_v62 = vand.u32 4294901760, %v524_v58  ;;  %p1372_p4 = pnand %p1371_p3, %p1365_p0 }
   0xf   :  { %1190 = vmatmul.mubr.f32.vlgmr.msra.gmra.mxu0 %v110_v29  ;;  %1195 = vmatpush3.msra.mxu1 %v152_v27  ;;  %v659_v54 = vsub.f32 %v1540_v44, %v658_v49  ;;  %v1571_v57 = vsub.f32 %v526_v46, %v1557_v51  ;;  %v1581_v61 = vsub.f32 %v525_v52, %v1567_v56  ;;  %vm1079_vm3 = vcmask 58368  }
  0x10   :  { %1204 = vmatpush3.msra.mxu0 %v142_v11  ;;  %1196 = vmatprep.subr.mxu1 %v1386_v3  ;;  %v665_v55 = vand.u32 4294901760, %v1554_v50 }
  0x11   :  { %1205 = vmatprep.subr.mxu0 %v1386_v3  ;;  %1197 = vmatpush3.msra.mxu1 %v159_v30  ;;  %v660_v59 = vand.u32 4294901760, %v659_v54  ;;  %v672_v63 = vand.u32 4294901760, %v1571_v57  ;;  %v679_v2 = vand.u32 4294901760, %v1581_v61 }
  0x12   :  { %1206 = vmatpush3.msra.mxu0 %v149_v13  ;;  %1198 = vmatprep.subr.mxu1 %v1386_v3  ;;  %v666_v60 = vsub.f32 %v1554_v50, %v665_v55 }
  0x13   :  { %1207 = vmatprep.subr.mxu0 %v1386_v3  ;;  %1199 = vmatpush3.msra.mxu1 %v166_v31  ;;  %v680_v7 = vsub.f32 %v1581_v61, %v679_v2 }
  0x14   :  { %1208 = vmatpush3.msra.mxu0 %v156_v14  ;;  %1201 = vmatmul.mubr.f32.vlgmr.msra.gmra.mxu1 %v1450_v12  ;;  %v667_v1 = vand.u32 4294901760, %v666_v60 }
  0x15   :  { %1209 = vmatprep.subr.mxu0 %v1386_v3  ;;  %1214 = vmatprep.subr.mxu1 %v1386_v3  ;;  %v681_v11 = vand.u32 4294901760, %v680_v7 }
  0x16   :  { %1210 = vmatpush3.msra.mxu0 %v163_v15  ;;  %1215 = vmatpush3.msra.mxu1 %v1429_v4 }
  0x17   :  { %1211 = vmatprep.mubr.msk.f32.mxu0 %vm1387_vm1, %v1386_v3  ;;  %1216 = vmatprep.subr.mxu1 %v1386_v3 }
  0x18   :  { %1225 = vmatprep.subr.mxu0 %v1386_v3  ;;  %1212 = vmatmul.mubr.f32.vlgmr.msra.gmra.mxu0 %v107_v17 }
  0x19   :  { %1217 = vmatpush3.msra.mxu1 %v1431_v5  ;;  %1226 = vmatpush3.msra.mxu0 %v143_v16 }
  0x1a   :  { %1218 = vmatprep.subr.mxu1 %v1386_v3  ;;  %1227 = vmatprep.subr.mxu0 %v1386_v3 }
  0x1b   :  { %1219 = vmatpush3.msra.mxu1 %v1433_v6  ;;  %1228 = vmatpush3.msra.mxu0 %v150_v18 }
  0x1c   :  { %1220 = vmatprep.subr.mxu1 %v1386_v3  ;;  %1229 = vmatprep.subr.mxu0 %v1386_v3 }
  0x1d   :  { %1221 = vmatpush3.msra.mxu1 %v1442_v9  ;;  %1222 = vmatprep.mubr.msk.f32.mxu1 %vm1387_vm1, %v1386_v3 }
  0x1e   :  { %1230 = vmatpush3.msra.mxu0 %v157_v19  ;;  %1223 = vmatmul.mubr.f32.vlgmr.msra.gmra.mxu1 %v108_v22 }
  0x1f   :  { %1231 = vmatprep.subr.mxu0 %v1386_v3  ;;  %1236 = vmatprep.subr.mxu1 %v1386_v3 }
  0x20   :  { %1232 = vmatpush3.msra.mxu0 %v164_v20  ;;  %1233 = vmatprep.mubr.msk.f32.mxu0 %vm1387_vm1, %v1386_v3  ;;  %v1095_v20 = vld [vmem:[%s1721_s2] ss:$0 sm:$0xff] }
  0x21   :  { %1237 = vmatpush3.msra.mxu1 %v1429_v4  ;;  %1234 = vmatmul.mubr.f32.vlgmr.msra.gmra.mxu0 %v1450_v12  ;;  %v1594_v4 = vsub.f32 %v524_v58, %v1583_v62 }
  0x22   :  { %1238 = vmatprep.subr.mxu1 %v1386_v3  ;;  %1244 = vmatprep.mubr.msk.f32.mxu1 %vm1387_vm1, %v1386_v3 }
  0x23   :  { %1239 = vmatpush3.msra.mxu1 %v1431_v5  ;;  %1247 = vmatprep.subr.mxu0 %v1386_v3  ;;  %v1596_v5 = vand.u32 4294901760, %v523_v0  ;;  %v686_v8 = vand.u32 4294901760, %v1594_v4 }
  0x24   :  { %1240 = vmatprep.subr.mxu1 %v1386_v3  ;;  %1263 = vmatprep.mubr.msk.f32.mxu0 %vm1387_vm1, %v1386_v3 }
  0x25   :  { %1241 = vmatpush3.msra.mxu1 %v1433_v6  ;;  %1248 = vmatpush3.msra.mxu0 %v1509_v33  ;;  %v673_v6 = vsub.f32 %v1571_v57, %v672_v63 }
  0x26   :  { %1242 = vmatprep.subr.mxu1 %v1386_v3  ;;  %1249 = vmatprep.subr.mxu0 %v1386_v3 }
  0x27   :  { %1243 = vmatpush3.msra.mxu1 %v1442_v9  ;;  %1250 = vmatpush3.msra.mxu0 %v1517_v36  ;;  %v1609_v9 = vsub.f32 %v523_v0, %v1596_v5  ;;  %v674_v10 = vand.u32 4294901760, %v673_v6 }
  0x28   :  { %1245 = vmatmul.mubr.f32.vlgmr.msra.gmra.mxu1 %v1450_v12  ;;  %1266 = vmatprep.subr.mxu1 %v1386_v3  ;;  %v687_v12 = vsub.f32 %v1594_v4, %v686_v8 }
  0x29   :  { %1282 = vmatprep.mubr.msk.f32.mxu1 %vm1387_vm1, %v1386_v3  ;;  %1251 = vmatprep.subr.mxu0 %v1386_v3  ;;  %v693_v13 = vand.u32 4294901760, %v1609_v9 }
  0x2a   :  { %1252 = vmatpush3.msra.mxu0 %v1528_v40  ;;  %1267 = vmatpush3.msra.mxu1 %v646_v47  ;;  %v688_v14 = vand.u32 4294901760, %v687_v12 }
  0x2b   :  { %1253 = vmatprep.subr.mxu0 %v1386_v3  ;;  %1268 = vmatprep.subr.mxu1 %v1386_v3  ;;  %v694_v15 = vsub.f32 %v1609_v9, %v693_v13 }
  0x2c   :  { %1254 = vmatpush3.msra.mxu0 %v1542_v45  ;;  %1269 = vmatpush3.msra.mxu1 %v653_v53 }
  0x2d   :  { %1255 = vmatprep.subr.mxu0 %v1386_v3  ;;  %1270 = vmatprep.subr.mxu1 %v1386_v3  ;;  %v695_v16 = vand.u32 4294901760, %v694_v15 }
  0x2e   :  { %1256 = vmatpush3.msra.mxu0 %v1557_v51  ;;  %1271 = vmatpush3.msra.mxu1 %v660_v59 }
  0x2f   :  { %1257 = vmatprep.subr.mxu0 %v1386_v3  ;;  %1272 = vmatprep.subr.mxu1 %v1386_v3 }
  0x30   :  { %1258 = vmatpush3.msra.mxu0 %v1567_v56  ;;  %1273 = vmatpush3.msra.mxu1 %v667_v1 }
  0x31   :  { %1259 = vmatprep.subr.mxu0 %v1386_v3  ;;  %1274 = vmatprep.subr.mxu1 %v1386_v3 }
  0x32   :  { %1260 = vmatpush3.msra.mxu0 %v1583_v62  ;;  %1275 = vmatpush3.msra.mxu1 %v674_v10 }
  0x33   :  { %1261 = vmatprep.subr.mxu0 %v1386_v3  ;;  %1276 = vmatprep.subr.mxu1 %v1386_v3 }
  0x34   :  { %1262 = vmatpush3.msra.mxu0 %v1596_v5  ;;  %1277 = vmatpush3.msra.mxu1 %v681_v11 }
  0x35   :  { %1285 = vmatprep.subr.mxu0 %v1386_v3  ;;  %1278 = vmatprep.subr.mxu1 %v1386_v3 }
  0x36   :  { %1279 = vmatpush3.msra.mxu1 %v688_v14 }
  0x37   :  { %1280 = vmatprep.subr.mxu1 %v1386_v3 }
  0x38   :  { %1281 = vmatpush3.msra.mxu1 %v695_v16 }
  0x39   :  { %1304 = vmatprep.subr.mxu1 %v1386_v3 }
  0xcf   :  { %v112_v17 = vpop.f32.mrf.mxu0 }
  0xd0   :  { %v113_v23 = vadd.f32 %v1095_v20, %v112_v17 }
  0xd1   :  { %v1191_v18 = vpop.f32.mrf.mxu0 }
  0xd4   :  { %v203_v19 = vpop.f32.mrf.mxu1 }
  0xd5   :  { %v204_v25 = vadd.f32 %v203_v19, %v113_v23 }
  0xd6   :  { %v1202_v21 = vpop.f32.mrf.mxu1 }
  0xd8   :  { %v283_v22 = vpop.f32.mrf.mxu0 }
  0xd9   :  { %v284_v28 = vadd.f32 %v283_v22, %v204_v25 }
  0xda   :  { %v1213_v24 = vpop.f32.mrf.mxu0 }
  0xde   :  { %v360_v26 = vpop.f32.mrf.mxu1 }
  0xdf   :  { %v361_v30 = vadd.f32 %v360_v26, %v284_v28 }
  0xe0   :  { %v1224_v27 = vpop.f32.mrf.mxu1 }
  0xe1   :  { %v443_v29 = vpop.f32.mrf.mxu0 }
  0xe2   :  { %v444_v32 = vadd.f32 %v443_v29, %v361_v30 }
  0xe3   :  { %v1235_v31 = vpop.f32.mrf.mxu0 }
  0xe8   :  { %v518_v34 = vpop.f32.mrf.mxu1 }
  0xe9   :  { %v519_v37 = vadd.f32 %v518_v34, %v444_v32 }
  0xea   :  { %v1246_v41 = vpop.f32.mrf.mxu1 }
  0xeb   :  { %v522_v42 = vmax.f32 %v519_v37, 0.0 }
  0xed   :  { %v540_v46 = vsel %vm538_vm2, %v522_v42, 0 }
  0xee   :  { %v1629_v47 = vand.u32 4294901760, %v540_v46 }
  0xf0   :  { %v616_v48 = vsub.f32 %v540_v46, %v1629_v47  ;;  %1283 = vmatmul.mubr.f32.vlgmr.msra.gmra.mxu1 %v1629_v47 }
  0xf1   :  { %1305 = vmatpush3.msra.mxu1 %v1509_v33  ;;  %1320 = vmatprep.mubr.msk.f32.mxu1 %vm1387_vm1, %v1386_v3 }
  0xf2   :  { %v617_v52 = vand.u32 4294901760, %v616_v48  ;;  %1306 = vmatprep.subr.mxu1 %v1386_v3 }
  0xf3   :  { %1307 = vmatpush3.msra.mxu1 %v1517_v36 }
  0xf4   :  { %1308 = vmatprep.subr.mxu1 %v1386_v3  ;;  %v618_v53 = vsub.f32 %v616_v48, %v617_v52 }
  0xf5   :  { %1309 = vmatpush3.msra.mxu1 %v1528_v40 }
  0xf6   :  { %1310 = vmatprep.subr.mxu1 %v1386_v3  ;;  %v619_v54 = vand.u32 4294901760, %v618_v53 }
  0xf7   :  { %1311 = vmatpush3.msra.mxu1 %v1542_v45 }
  0xf8   :  { %1312 = vmatprep.subr.mxu1 %v1386_v3  ;;  %1264 = vmatmul.mubr.f32.vlgmr.msra.gmra.mxu0 %v619_v54 }
  0xf9   :  { %1286 = vmatpush3.msra.mxu0 %v1515_v35  ;;  %1313 = vmatpush3.msra.mxu1 %v1557_v51 }
  0xfa   :  { %1287 = vmatprep.subr.mxu0 %v1386_v3  ;;  %1314 = vmatprep.subr.mxu1 %v1386_v3 }
  0xfb   :  { %1288 = vmatpush3.msra.mxu0 %v1526_v39  ;;  %1315 = vmatpush3.msra.mxu1 %v1567_v56 }
  0xfc   :  { %1289 = vmatprep.subr.mxu0 %v1386_v3  ;;  %1316 = vmatprep.subr.mxu1 %v1386_v3 }
  0xfd   :  { %1290 = vmatpush3.msra.mxu0 %v1540_v44  ;;  %1317 = vmatpush3.msra.mxu1 %v1583_v62 }
  0xfe   :  { %1291 = vmatprep.subr.mxu0 %v1386_v3  ;;  %1318 = vmatprep.subr.mxu1 %v1386_v3 }
  0xff   :  { %1292 = vmatpush3.msra.mxu0 %v1554_v50  ;;  %1319 = vmatpush3.msra.mxu1 %v1596_v5 }
 0x100   :  { %1293 = vmatprep.subr.mxu0 %v1386_v3  ;;  %1321 = vmatmul.mubr.f32.vlgmr.msra.gmra.mxu1 %v617_v52 }
 0x101   :  { %1342 = vmatprep.subr.mxu1 %v1386_v3  ;;  %1294 = vmatpush3.msra.mxu0 %v1571_v57 }
 0x102   :  { %1343 = vmatpush3.msra.mxu1 %v1509_v33  ;;  %1295 = vmatprep.subr.mxu0 %v1386_v3 }
 0x103   :  { %1344 = vmatprep.subr.mxu1 %v1386_v3  ;;  %1296 = vmatpush3.msra.mxu0 %v1581_v61 }
 0x104   :  { %1345 = vmatpush3.msra.mxu1 %v1517_v36  ;;  %1297 = vmatprep.subr.mxu0 %v1386_v3 }
 0x105   :  { %1346 = vmatprep.subr.mxu1 %v1386_v3  ;;  %1298 = vmatpush3.msra.mxu0 %v1594_v4 }
 0x106   :  { %1347 = vmatpush3.msra.mxu1 %v1528_v40  ;;  %1299 = vmatprep.subr.mxu0 %v1386_v3 }
 0x107   :  { %1348 = vmatprep.subr.mxu1 %v1386_v3  ;;  %1300 = vmatpush3.msra.mxu0 %v1609_v9 }
 0x108   :  { %1301 = vmatprep.mubr.msk.f32.mxu0 %vm1387_vm1, %v1386_v3  ;;  %1349 = vmatpush3.msra.mxu1 %v1542_v45  ;;  %v1096_v45 = vld [vmem:[%s1723_s4] ss:$0 sm:$0xff] }
 0x109   :  { %1302 = vmatmul.mubr.f32.vlgmr.msra.gmra.mxu0 %v616_v48  ;;  %1323 = vmatprep.subr.mxu0 %v1386_v3 }
 0x10a   :  { %1350 = vmatprep.subr.mxu1 %v1386_v3  ;;  %1324 = vmatpush3.msra.mxu0 %v644_v38 }
 0x10b   :  { %1351 = vmatpush3.msra.mxu1 %v1557_v51  ;;  %1325 = vmatprep.subr.mxu0 %v1386_v3 }
 0x10c   :  { %1352 = vmatprep.subr.mxu1 %v1386_v3  ;;  %1326 = vmatpush3.msra.mxu0 %v651_v43 }
 0x10d   :  { %1353 = vmatpush3.msra.mxu1 %v1567_v56  ;;  %1327 = vmatprep.subr.mxu0 %v1386_v3 }
 0x10e   :  { %1354 = vmatprep.subr.mxu1 %v1386_v3  ;;  %1328 = vmatpush3.msra.mxu0 %v658_v49 }
 0x10f   :  { %1355 = vmatpush3.msra.mxu1 %v1583_v62  ;;  %1329 = vmatprep.subr.mxu0 %v1386_v3 }
 0x110   :  { %1356 = vmatprep.subr.mxu1 %v1386_v3  ;;  %1330 = vmatpush3.msra.mxu0 %v665_v55 }
 0x111   :  { %1357 = vmatpush3.msra.mxu1 %v1596_v5  ;;  %1358 = vmatprep.mubr.msk.f32.mxu1 %vm1387_vm1, %v1386_v3 }
 0x112   :  { %1331 = vmatprep.subr.mxu0 %v1386_v3  ;;  %1359 = vmatmul.mubr.f32.vlgmr.msra.gmra.mxu1 %v1629_v47 }
 0x113   :  { %1332 = vmatpush3.msra.mxu0 %v672_v63  ;;  %1339 = vmatprep.mubr.msk.f32.mxu0 %vm1387_vm1, %v1386_v3 }
 0x114   :  { %1333 = vmatprep.subr.mxu0 %v1386_v3 }
 0x115   :  { %1334 = vmatpush3.msra.mxu0 %v679_v2 }
 0x116   :  { %1335 = vmatprep.subr.mxu0 %v1386_v3 }
 0x117   :  { %1336 = vmatpush3.msra.mxu0 %v686_v8 }
 0x118   :  { %1337 = vmatprep.subr.mxu0 %v1386_v3 }
 0x119   :  { %1338 = vmatpush3.msra.mxu0 %v693_v13 }
 0x11a   :  { %1340 = vmatmul.mubr.f32.vlgmr.msra.gmra.mxu0 %v1629_v47 }
 0x1b0   :  { %v732_v33 = vpop.f32.mrf.mxu1 }
 0x1b2   :  { %v1284_v35 = vpop.f32.mrf.mxu1 }
 0x1b8   :  { %v621_v36 = vpop.f32.mrf.mxu0 }
 0x1b9   :  { %v622_v49 = vadd.f32 %v1096_v45, %v621_v36 }
 0x1ba   :  { %v1265_v38 = vpop.f32.mrf.mxu0 }
 0x1bb   :  { %v733_v3 = vadd.f32 %v732_v33, %v622_v49 }
 0x1c0   :  { %v901_v39 = vpop.f32.mrf.mxu1 }
 0x1c2   :  { %v1322_v40 = vpop.f32.mrf.mxu1 }
 0x1c9   :  { %v820_v43 = vpop.f32.mrf.mxu0 }
 0x1ca   :  { %v821_v55 = vadd.f32 %v820_v43, %v733_v3 }
 0x1cb   :  { %v1303_v44 = vpop.f32.mrf.mxu0 }
 0x1cc   :  { %v902_v56 = vadd.f32 %v901_v39, %v821_v55 }
 0x1d2   :  { %v1075_v50 = vpop.f32.mrf.mxu1 }
 0x1d4   :  { %v1360_v51 = vpop.f32.mrf.mxu1 }
 0x1da   :  { %v996_v57 = vpop.f32.mrf.mxu0 }
 0x1db   :  { %v997_v58 = vadd.f32 %v996_v57, %v902_v56 }
 0x1dc   :  { %v1341_v59 = vpop.f32.mrf.mxu0 }
 0x1dd   :  { %v1076_v60 = vadd.f32 %v1075_v50, %v997_v58 }
 0x1df   :  { %1080 = vst.msk [vmem:[#allocation2] sm:$0x3] %vm1079_vm3, %v1076_v60 }
 0x1e0   :  { %1375 = shalt.err (!%p1372_p4)
}
 0x1e1   :  { %1090 = dma.vmem_to_hbm [thread:$0]  %s1088_s20, 32, %s1724_s5, [#allocation3]  }
 0x1e2   :  { %1384 = dma.done.wait [#allocation3], 32  }
 0x1e3   :  { %1385 = vsyncadd [#allocation3], 4294967264 }
 0x1e4   :  { %1094 = vsyncpa [#allocation3], 1 }

</bundles_post_ra>
